<compile_context>
chip_gen: v7x
topology: tpu7x:2x2x1
jax: 0.10.0
libtpu: 0.0.40
codegen_flags: <defaults>
</compile_context>

<pallas_src>
import functools

import jax
import jax.numpy as jnp
from jax import lax
from jax.experimental import pallas as pl
from jax.experimental.pallas import tpu as pltpu


def _scatter_mats(H, W):
    """Constant 0/1 stride-2 scatter matrices (built once in the wrapper).

    R_stack[ho, kh*H + h] = 1  iff  ho == 2*h + kh - 1   (H upsample+interleave)
    P[kw, w, wo]          = 1  iff  wo == 2*w + kw - 1   (W upsample)
    Boundary clipping (padding=1, output_padding=1) falls out of the index
    ranges, matching ConvTranspose2d exactly.
    """
    Ho, Wo = 2 * H, 2 * W
    ho = jnp.arange(Ho)[:, None]
    kh = (jnp.arange(3 * H) // H)[None, :]
    h = (jnp.arange(3 * H) % H)[None, :]
    r_stack = (ho == 2 * h + kh - 1).astype(jnp.float32)          # (Ho, 3H)

    kw = jnp.arange(3)[:, None, None]
    w = jnp.arange(W)[None, :, None]
    wo = jnp.arange(Wo)[None, None, :]
    p = (wo == 2 * w + kw - 1).astype(jnp.float32)                # (3, W, Wo)
    return r_stack, p


def _expanding_block_kernel(x_ref, w_ref, b_ref, r_ref, p_ref, o_ref, *, use_norm):
    # x_ref : (1, Cin, H, W)   VMEM  one batch item (block index constant over co)
    # w_ref : (Cout*9*Cin,)    SMEM  flat weights, [co*9*Cin + (kh*3+kw)*Cin + ci]
    # b_ref : (Cout,)          SMEM  conv bias (only used when use_norm=False)
    # r_ref : (Ho, 3H)         VMEM  resident H-scatter matrix
    # p_ref : (3, W, Wo)       VMEM  resident W-scatter matrices
    # o_ref : (1, 1, Ho, Wo)   VMEM  output block for one (n, co)
    cin = x_ref.shape[1]
    H, W = x_ref.shape[2], x_ref.shape[3]
    Ho, Wo = o_ref.shape[2], o_ref.shape[3]
    co = pl.program_id(1)
    w_base = co * (9 * cin)

    # --- channel contraction: 9 tap planes kept as SSA f32 values (no scratch,
    #     no RMW; each weight scalar read/splat exactly once).
    x_planes = [x_ref[0, ci].astype(jnp.float32) for ci in range(cin)]   # (H, W)
    taps = []
    for kh in range(3):
        row = []
        for kw in range(3):
            base = w_base + (kh * 3 + kw) * cin
            t = w_ref[base] * x_planes[0]
            for ci in range(1, cin):
                t = t + w_ref[base + ci] * x_planes[ci]
            row.append(t)
        taps.append(row)

    # --- W-scatter (MXU): one dot per kw with all three kh planes stacked on
    #     sublanes, summed in SSA -> t_all[kh*H + h, wo].
    t_all = None
    for kw in range(3):
        v_kw = jnp.concatenate([taps[0][kw], taps[1][kw], taps[2][kw]], axis=0)  # (3H, W)
        part = jnp.dot(v_kw, p_ref[kw], preferred_element_type=jnp.float32)      # (3H, Wo)
        t_all = part if t_all is None else t_all + part

    # --- H-scatter + even/odd row interleave (MXU): one dot, K = 3H.
    y = jnp.dot(r_ref[...], t_all, preferred_element_type=jnp.float32)           # (Ho, Wo)

    if use_norm:
        # InstanceNorm2d (no affine, biased variance, eps=1e-5); the per-channel
        # conv bias cancels exactly under this normalization -> folded away.
        inv_n = 1.0 / float(Ho * Wo)
        mean = jnp.sum(jnp.sum(y, axis=1, keepdims=True),
                       axis=0, keepdims=True) * inv_n
        cent = y - mean
        var = jnp.sum(jnp.sum(cent * cent, axis=1, keepdims=True),
                      axis=0, keepdims=True) * inv_n
        y = cent * lax.rsqrt(var + 1e-5)
    else:
        y = y + b_ref[co]

    # Single store per grid step (f32 until here; cast only at the store).
    o_ref[0, 0, :, :] = jnp.maximum(y, 0.0).astype(o_ref.dtype)


def expanding_block_forward(x_nchw, w_t, b, *, use_bn: bool = True):
    """x_nchw: (N, C, H, W) (PyTorch layout, used end-to-end).
    w_t: ConvTranspose2d weight (C, C//2, 3, 3).  b: (C//2,)."""
    N, C, H, W = x_nchw.shape
    Cout = C // 2
    assert w_t.shape == (C, Cout, 3, 3)
    Ho, Wo = 2 * H, 2 * W

    # Flat 1-D SMEM weight table: [co*9*C + (kh*3+kw)*C + ci] = w_t[ci, co, kh, kw].
    # (No spatial flip: the gather-form scatter matrices use the ConvTranspose
    #  weight orientation directly.)
    w_flat = jnp.transpose(w_t, (1, 2, 3, 0)).reshape(-1).astype(jnp.float32)
    b_f32 = b.astype(jnp.float32)

    # Constant scatter matrices, hoisted out of the kernel (resident VMEM inputs).
    r_stack, p_stack = _scatter_mats(H, W)

    kernel = functools.partial(_expanding_block_kernel, use_norm=use_bn)

    # VMEM budget: double-buffered blocks + resident scatter matrices + headroom,
    # clamped to 48 MiB so there is slack under v7x's 64 MiB physical VMEM.
    def _pad(v, m):
        return (v + m - 1) // m * m
    blk_x = C * _pad(H, 8) * _pad(W, 128) * 4
    blk_o = _pad(Ho, 8) * _pad(Wo, 128) * 4
    blk_r = _pad(Ho, 8) * _pad(3 * H, 128) * 4
    blk_p = 3 * _pad(W, 8) * _pad(Wo, 128) * 4
    vmem_limit = int(min(max(2 * (blk_x + blk_o + blk_r + blk_p) + (4 << 20),
                             8 << 20), 48 << 20))

    # Advisory cost estimate for the XLA scheduler.
    flops = 2 * N * Cout * (9 * C * H * W               # channel contraction
                            + 3 * (3 * H) * W * Wo      # W-scatter dots
                            + Ho * (3 * H) * Wo)        # H-scatter dot
    bytes_accessed = (x_nchw.size + N * Cout * Ho * Wo) * 4 \
        + (w_flat.size + b_f32.size + r_stack.size + p_stack.size) * 4
    transcendentals = N * Cout if use_bn else 0

    return pl.pallas_call(
        kernel,
        out_shape=jax.ShapeDtypeStruct((N, Cout, Ho, Wo), x_nchw.dtype),
        grid=(N, Cout),
        in_specs=[
            pl.BlockSpec((1, C, H, W), lambda n, co: (n, 0, 0, 0)),
            pl.BlockSpec(memory_space=pltpu.MemorySpace.SMEM),
            pl.BlockSpec(memory_space=pltpu.MemorySpace.SMEM),
            pl.BlockSpec((Ho, 3 * H), lambda n, co: (0, 0)),      # resident
            pl.BlockSpec((3, W, Wo), lambda n, co: (0, 0, 0)),    # resident
        ],
        out_specs=pl.BlockSpec((1, 1, Ho, Wo), lambda n, co: (n, co, 0, 0)),
        compiler_params=pltpu.CompilerParams(
            dimension_semantics=("parallel", "parallel"),
            vmem_limit_bytes=vmem_limit,
        ),
        cost_estimate=pl.CostEstimate(flops=int(flops),
                                      transcendentals=int(transcendentals),
                                      bytes_accessed=int(bytes_accessed)),
    )(x_nchw, w_flat, b_f32, r_stack, p_stack)


def _reference_forward(x_nchw, w_t, b, *, use_bn: bool = True):
    """Pure-JAX reference of the same math (sanity check)."""
    Cout = w_t.shape[1]
    w_oihw = jnp.transpose(w_t[:, :, ::-1, ::-1], (1, 0, 2, 3))
    y = lax.conv_general_dilated(
        x_nchw, w_oihw, window_strides=(1, 1),
        padding=((1, 2), (1, 2)), lhs_dilation=(2, 2),
        dimension_numbers=("NCHW", "OIHW", "NCHW"),
    ) + b.reshape(1, Cout, 1, 1)
    if use_bn:
        mean = jnp.mean(y, axis=(2, 3), keepdims=True)
        var = jnp.mean((y - mean) ** 2, axis=(2, 3), keepdims=True)
        y = (y - mean) * lax.rsqrt(var + 1e-5)
    return jnp.maximum(y, 0.0)


if __name__ == "__main__":
    key = jax.random.PRNGKey(0)
    kx, kw_, kb = jax.random.split(key, 3)

    N, C, H, W = 2, 4, 16, 16        # input_channels = 4 -> output channels = 2
    Cout = C // 2

    x = jax.random.normal(kx, (N, C, H, W), dtype=jnp.float32)
    # ConvTranspose2d weight shape: (in_channels, out_channels, kH, kW)
    w_t = 0.1 * jax.random.normal(kw_, (C, Cout, 3, 3), dtype=jnp.float32)
    b = 0.1 * jax.random.normal(kb, (Cout,), dtype=jnp.float32)

    out = jax.block_until_ready(expanding_block_forward(x, w_t, b, use_bn=True))
    assert out.shape == (N, Cout, 2 * H, 2 * W), out.shape
    ref = jax.block_until_ready(_reference_forward(x, w_t, b, use_bn=True))
    assert jnp.allclose(out, ref, atol=1e-4, rtol=1e-4)

    out2 = jax.block_until_ready(expanding_block_forward(x, w_t, b, use_bn=False))
    ref2 = jax.block_until_ready(_reference_forward(x, w_t, b, use_bn=False))
    assert jnp.allclose(out2, ref2, atol=1e-4, rtol=1e-4)

    print("KERNEL_OK")
</pallas_src>

<mosaic_0001>
module attributes {stable_mosaic.version = 11 : i64} {
  func.func @_expanding_block_kernel(%arg0: i32, %arg1: i32, %arg2: memref<1x4x16x16xf32, #tpu.memory_space<vmem>>, %arg3: memref<72xf32, #tpu.memory_space<smem>>, %arg4: memref<2xf32, #tpu.memory_space<smem>>, %arg5: memref<32x48xf32, #tpu.memory_space<vmem>>, %arg6: memref<3x16x32xf32, #tpu.memory_space<vmem>>, %arg7: memref<1x1x32x32xf32, #tpu.memory_space<vmem>>) attributes {dimension_semantics = [#tpu.dimension_semantics<parallel>, #tpu.dimension_semantics<parallel>], iteration_bounds = array<i64: 2, 2>, scalar_prefetch = 0 : i64, scratch_operands = 0 : i64, tpu.core_type = #tpu.core_type<tc>, window_params = [{transform_indices = @transform_0, window_bounds = array<i64: 1, 4, 16, 16>}, {transform_indices = @transform_1, window_bounds = array<i64: 72>}, {transform_indices = @transform_2, window_bounds = array<i64: 2>}, {pipeline_mode = #tpu.pipeline_mode<synchronous>, transform_indices = @transform_3, window_bounds = array<i64: 32, 48>}, {pipeline_mode = #tpu.pipeline_mode<synchronous>, transform_indices = @transform_4, window_bounds = array<i64: 3, 16, 32>}, {transform_indices = @transform_5, window_bounds = array<i64: 1, 1, 32, 32>}]} {
    %c36_i32 = arith.constant 36 : i32
    %0 = arith.muli %arg1, %c36_i32 : i32
    %c0 = arith.constant 0 : index
    %c0_0 = arith.constant 0 : index
    %c0_1 = arith.constant 0 : index
    %c0_2 = arith.constant 0 : index
    %1 = vector.load %arg2[%c0, %c0_0, %c0_1, %c0_2] : memref<1x4x16x16xf32, #tpu.memory_space<vmem>>, vector<1x1x16x16xf32>
    %2 = vector.shape_cast %1 : vector<1x1x16x16xf32> to vector<16x16xf32>
    %c0_3 = arith.constant 0 : index
    %c1 = arith.constant 1 : index
    %c0_4 = arith.constant 0 : index
    %c0_5 = arith.constant 0 : index
    %3 = vector.load %arg2[%c0_3, %c1, %c0_4, %c0_5] : memref<1x4x16x16xf32, #tpu.memory_space<vmem>>, vector<1x1x16x16xf32>
    %4 = vector.shape_cast %3 : vector<1x1x16x16xf32> to vector<16x16xf32>
    %c0_6 = arith.constant 0 : index
    %c2 = arith.constant 2 : index
    %c0_7 = arith.constant 0 : index
    %c0_8 = arith.constant 0 : index
    %5 = vector.load %arg2[%c0_6, %c2, %c0_7, %c0_8] : memref<1x4x16x16xf32, #tpu.memory_space<vmem>>, vector<1x1x16x16xf32>
    %6 = vector.shape_cast %5 : vector<1x1x16x16xf32> to vector<16x16xf32>
    %c0_9 = arith.constant 0 : index
    %c3 = arith.constant 3 : index
    %c0_10 = arith.constant 0 : index
    %c0_11 = arith.constant 0 : index
    %7 = vector.load %arg2[%c0_9, %c3, %c0_10, %c0_11] : memref<1x4x16x16xf32, #tpu.memory_space<vmem>>, vector<1x1x16x16xf32>
    %8 = vector.shape_cast %7 : vector<1x1x16x16xf32> to vector<16x16xf32>
    %c0_i32 = arith.constant 0 : i32
    %9 = arith.addi %0, %c0_i32 : i32
    %10 = arith.index_cast %9 : i32 to index
    %11 = memref.load %arg3[%10] : memref<72xf32, #tpu.memory_space<smem>>
    %12 = vector.broadcast %11 : f32 to vector<16x16xf32>
    %13 = arith.mulf %12, %2 : vector<16x16xf32>
    %c1_i32 = arith.constant 1 : i32
    %14 = arith.addi %9, %c1_i32 : i32
    %15 = arith.index_cast %14 : i32 to index
    %16 = memref.load %arg3[%15] : memref<72xf32, #tpu.memory_space<smem>>
    %17 = vector.broadcast %16 : f32 to vector<16x16xf32>
    %18 = arith.mulf %17, %4 : vector<16x16xf32>
    %19 = arith.addf %13, %18 : vector<16x16xf32>
    %c2_i32 = arith.constant 2 : i32
    %20 = arith.addi %9, %c2_i32 : i32
    %21 = arith.index_cast %20 : i32 to index
    %22 = memref.load %arg3[%21] : memref<72xf32, #tpu.memory_space<smem>>
    %23 = vector.broadcast %22 : f32 to vector<16x16xf32>
    %24 = arith.mulf %23, %6 : vector<16x16xf32>
    %25 = arith.addf %19, %24 : vector<16x16xf32>
    %c3_i32 = arith.constant 3 : i32
    %26 = arith.addi %9, %c3_i32 : i32
    %27 = arith.index_cast %26 : i32 to index
    %28 = memref.load %arg3[%27] : memref<72xf32, #tpu.memory_space<smem>>
    %29 = vector.broadcast %28 : f32 to vector<16x16xf32>
    %30 = arith.mulf %29, %8 : vector<16x16xf32>
    %31 = arith.addf %25, %30 : vector<16x16xf32>
    %c4_i32 = arith.constant 4 : i32
    %32 = arith.addi %0, %c4_i32 : i32
    %33 = arith.index_cast %32 : i32 to index
    %34 = memref.load %arg3[%33] : memref<72xf32, #tpu.memory_space<smem>>
    %35 = vector.broadcast %34 : f32 to vector<16x16xf32>
    %36 = arith.mulf %35, %2 : vector<16x16xf32>
    %c1_i32_12 = arith.constant 1 : i32
    %37 = arith.addi %32, %c1_i32_12 : i32
    %38 = arith.index_cast %37 : i32 to index
    %39 = memref.load %arg3[%38] : memref<72xf32, #tpu.memory_space<smem>>
    %40 = vector.broadcast %39 : f32 to vector<16x16xf32>
    %41 = arith.mulf %40, %4 : vector<16x16xf32>
    %42 = arith.addf %36, %41 : vector<16x16xf32>
    %c2_i32_13 = arith.constant 2 : i32
    %43 = arith.addi %32, %c2_i32_13 : i32
    %44 = arith.index_cast %43 : i32 to index
    %45 = memref.load %arg3[%44] : memref<72xf32, #tpu.memory_space<smem>>
    %46 = vector.broadcast %45 : f32 to vector<16x16xf32>
    %47 = arith.mulf %46, %6 : vector<16x16xf32>
    %48 = arith.addf %42, %47 : vector<16x16xf32>
    %c3_i32_14 = arith.constant 3 : i32
    %49 = arith.addi %32, %c3_i32_14 : i32
    %50 = arith.index_cast %49 : i32 to index
    %51 = memref.load %arg3[%50] : memref<72xf32, #tpu.memory_space<smem>>
    %52 = vector.broadcast %51 : f32 to vector<16x16xf32>
    %53 = arith.mulf %52, %8 : vector<16x16xf32>
    %54 = arith.addf %48, %53 : vector<16x16xf32>
    %c8_i32 = arith.constant 8 : i32
    %55 = arith.addi %0, %c8_i32 : i32
    %56 = arith.index_cast %55 : i32 to index
    %57 = memref.load %arg3[%56] : memref<72xf32, #tpu.memory_space<smem>>
    %58 = vector.broadcast %57 : f32 to vector<16x16xf32>
    %59 = arith.mulf %58, %2 : vector<16x16xf32>
    %c1_i32_15 = arith.constant 1 : i32
    %60 = arith.addi %55, %c1_i32_15 : i32
    %61 = arith.index_cast %60 : i32 to index
    %62 = memref.load %arg3[%61] : memref<72xf32, #tpu.memory_space<smem>>
    %63 = vector.broadcast %62 : f32 to vector<16x16xf32>
    %64 = arith.mulf %63, %4 : vector<16x16xf32>
    %65 = arith.addf %59, %64 : vector<16x16xf32>
    %c2_i32_16 = arith.constant 2 : i32
    %66 = arith.addi %55, %c2_i32_16 : i32
    %67 = arith.index_cast %66 : i32 to index
    %68 = memref.load %arg3[%67] : memref<72xf32, #tpu.memory_space<smem>>
    %69 = vector.broadcast %68 : f32 to vector<16x16xf32>
    %70 = arith.mulf %69, %6 : vector<16x16xf32>
    %71 = arith.addf %65, %70 : vector<16x16xf32>
    %c3_i32_17 = arith.constant 3 : i32
    %72 = arith.addi %55, %c3_i32_17 : i32
    %73 = arith.index_cast %72 : i32 to index
    %74 = memref.load %arg3[%73] : memref<72xf32, #tpu.memory_space<smem>>
    %75 = vector.broadcast %74 : f32 to vector<16x16xf32>
    %76 = arith.mulf %75, %8 : vector<16x16xf32>
    %77 = arith.addf %71, %76 : vector<16x16xf32>
    %c12_i32 = arith.constant 12 : i32
    %78 = arith.addi %0, %c12_i32 : i32
    %79 = arith.index_cast %78 : i32 to index
    %80 = memref.load %arg3[%79] : memref<72xf32, #tpu.memory_space<smem>>
    %81 = vector.broadcast %80 : f32 to vector<16x16xf32>
    %82 = arith.mulf %81, %2 : vector<16x16xf32>
    %c1_i32_18 = arith.constant 1 : i32
    %83 = arith.addi %78, %c1_i32_18 : i32
    %84 = arith.index_cast %83 : i32 to index
    %85 = memref.load %arg3[%84] : memref<72xf32, #tpu.memory_space<smem>>
    %86 = vector.broadcast %85 : f32 to vector<16x16xf32>
    %87 = arith.mulf %86, %4 : vector<16x16xf32>
    %88 = arith.addf %82, %87 : vector<16x16xf32>
    %c2_i32_19 = arith.constant 2 : i32
    %89 = arith.addi %78, %c2_i32_19 : i32
    %90 = arith.index_cast %89 : i32 to index
    %91 = memref.load %arg3[%90] : memref<72xf32, #tpu.memory_space<smem>>
    %92 = vector.broadcast %91 : f32 to vector<16x16xf32>
    %93 = arith.mulf %92, %6 : vector<16x16xf32>
    %94 = arith.addf %88, %93 : vector<16x16xf32>
    %c3_i32_20 = arith.constant 3 : i32
    %95 = arith.addi %78, %c3_i32_20 : i32
    %96 = arith.index_cast %95 : i32 to index
    %97 = memref.load %arg3[%96] : memref<72xf32, #tpu.memory_space<smem>>
    %98 = vector.broadcast %97 : f32 to vector<16x16xf32>
    %99 = arith.mulf %98, %8 : vector<16x16xf32>
    %100 = arith.addf %94, %99 : vector<16x16xf32>
    %c16_i32 = arith.constant 16 : i32
    %101 = arith.addi %0, %c16_i32 : i32
    %102 = arith.index_cast %101 : i32 to index
    %103 = memref.load %arg3[%102] : memref<72xf32, #tpu.memory_space<smem>>
    %104 = vector.broadcast %103 : f32 to vector<16x16xf32>
    %105 = arith.mulf %104, %2 : vector<16x16xf32>
    %c1_i32_21 = arith.constant 1 : i32
    %106 = arith.addi %101, %c1_i32_21 : i32
    %107 = arith.index_cast %106 : i32 to index
    %108 = memref.load %arg3[%107] : memref<72xf32, #tpu.memory_space<smem>>
    %109 = vector.broadcast %108 : f32 to vector<16x16xf32>
    %110 = arith.mulf %109, %4 : vector<16x16xf32>
    %111 = arith.addf %105, %110 : vector<16x16xf32>
    %c2_i32_22 = arith.constant 2 : i32
    %112 = arith.addi %101, %c2_i32_22 : i32
    %113 = arith.index_cast %112 : i32 to index
    %114 = memref.load %arg3[%113] : memref<72xf32, #tpu.memory_space<smem>>
    %115 = vector.broadcast %114 : f32 to vector<16x16xf32>
    %116 = arith.mulf %115, %6 : vector<16x16xf32>
    %117 = arith.addf %111, %116 : vector<16x16xf32>
    %c3_i32_23 = arith.constant 3 : i32
    %118 = arith.addi %101, %c3_i32_23 : i32
    %119 = arith.index_cast %118 : i32 to index
    %120 = memref.load %arg3[%119] : memref<72xf32, #tpu.memory_space<smem>>
    %121 = vector.broadcast %120 : f32 to vector<16x16xf32>
    %122 = arith.mulf %121, %8 : vector<16x16xf32>
    %123 = arith.addf %117, %122 : vector<16x16xf32>
    %c20_i32 = arith.constant 20 : i32
    %124 = arith.addi %0, %c20_i32 : i32
    %125 = arith.index_cast %124 : i32 to index
    %126 = memref.load %arg3[%125] : memref<72xf32, #tpu.memory_space<smem>>
    %127 = vector.broadcast %126 : f32 to vector<16x16xf32>
    %128 = arith.mulf %127, %2 : vector<16x16xf32>
    %c1_i32_24 = arith.constant 1 : i32
    %129 = arith.addi %124, %c1_i32_24 : i32
    %130 = arith.index_cast %129 : i32 to index
    %131 = memref.load %arg3[%130] : memref<72xf32, #tpu.memory_space<smem>>
    %132 = vector.broadcast %131 : f32 to vector<16x16xf32>
    %133 = arith.mulf %132, %4 : vector<16x16xf32>
    %134 = arith.addf %128, %133 : vector<16x16xf32>
    %c2_i32_25 = arith.constant 2 : i32
    %135 = arith.addi %124, %c2_i32_25 : i32
    %136 = arith.index_cast %135 : i32 to index
    %137 = memref.load %arg3[%136] : memref<72xf32, #tpu.memory_space<smem>>
    %138 = vector.broadcast %137 : f32 to vector<16x16xf32>
    %139 = arith.mulf %138, %6 : vector<16x16xf32>
    %140 = arith.addf %134, %139 : vector<16x16xf32>
    %c3_i32_26 = arith.constant 3 : i32
    %141 = arith.addi %124, %c3_i32_26 : i32
    %142 = arith.index_cast %141 : i32 to index
    %143 = memref.load %arg3[%142] : memref<72xf32, #tpu.memory_space<smem>>
    %144 = vector.broadcast %143 : f32 to vector<16x16xf32>
    %145 = arith.mulf %144, %8 : vector<16x16xf32>
    %146 = arith.addf %140, %145 : vector<16x16xf32>
    %c24_i32 = arith.constant 24 : i32
    %147 = arith.addi %0, %c24_i32 : i32
    %148 = arith.index_cast %147 : i32 to index
    %149 = memref.load %arg3[%148] : memref<72xf32, #tpu.memory_space<smem>>
    %150 = vector.broadcast %149 : f32 to vector<16x16xf32>
    %151 = arith.mulf %150, %2 : vector<16x16xf32>
    %c1_i32_27 = arith.constant 1 : i32
    %152 = arith.addi %147, %c1_i32_27 : i32
    %153 = arith.index_cast %152 : i32 to index
    %154 = memref.load %arg3[%153] : memref<72xf32, #tpu.memory_space<smem>>
    %155 = vector.broadcast %154 : f32 to vector<16x16xf32>
    %156 = arith.mulf %155, %4 : vector<16x16xf32>
    %157 = arith.addf %151, %156 : vector<16x16xf32>
    %c2_i32_28 = arith.constant 2 : i32
    %158 = arith.addi %147, %c2_i32_28 : i32
    %159 = arith.index_cast %158 : i32 to index
    %160 = memref.load %arg3[%159] : memref<72xf32, #tpu.memory_space<smem>>
    %161 = vector.broadcast %160 : f32 to vector<16x16xf32>
    %162 = arith.mulf %161, %6 : vector<16x16xf32>
    %163 = arith.addf %157, %162 : vector<16x16xf32>
    %c3_i32_29 = arith.constant 3 : i32
    %164 = arith.addi %147, %c3_i32_29 : i32
    %165 = arith.index_cast %164 : i32 to index
    %166 = memref.load %arg3[%165] : memref<72xf32, #tpu.memory_space<smem>>
    %167 = vector.broadcast %166 : f32 to vector<16x16xf32>
    %168 = arith.mulf %167, %8 : vector<16x16xf32>
    %169 = arith.addf %163, %168 : vector<16x16xf32>
    %c28_i32 = arith.constant 28 : i32
    %170 = arith.addi %0, %c28_i32 : i32
    %171 = arith.index_cast %170 : i32 to index
    %172 = memref.load %arg3[%171] : memref<72xf32, #tpu.memory_space<smem>>
    %173 = vector.broadcast %172 : f32 to vector<16x16xf32>
    %174 = arith.mulf %173, %2 : vector<16x16xf32>
    %c1_i32_30 = arith.constant 1 : i32
    %175 = arith.addi %170, %c1_i32_30 : i32
    %176 = arith.index_cast %175 : i32 to index
    %177 = memref.load %arg3[%176] : memref<72xf32, #tpu.memory_space<smem>>
    %178 = vector.broadcast %177 : f32 to vector<16x16xf32>
    %179 = arith.mulf %178, %4 : vector<16x16xf32>
    %180 = arith.addf %174, %179 : vector<16x16xf32>
    %c2_i32_31 = arith.constant 2 : i32
    %181 = arith.addi %170, %c2_i32_31 : i32
    %182 = arith.index_cast %181 : i32 to index
    %183 = memref.load %arg3[%182] : memref<72xf32, #tpu.memory_space<smem>>
    %184 = vector.broadcast %183 : f32 to vector<16x16xf32>
    %185 = arith.mulf %184, %6 : vector<16x16xf32>
    %186 = arith.addf %180, %185 : vector<16x16xf32>
    %c3_i32_32 = arith.constant 3 : i32
    %187 = arith.addi %170, %c3_i32_32 : i32
    %188 = arith.index_cast %187 : i32 to index
    %189 = memref.load %arg3[%188] : memref<72xf32, #tpu.memory_space<smem>>
    %190 = vector.broadcast %189 : f32 to vector<16x16xf32>
    %191 = arith.mulf %190, %8 : vector<16x16xf32>
    %192 = arith.addf %186, %191 : vector<16x16xf32>
    %c32_i32 = arith.constant 32 : i32
    %193 = arith.addi %0, %c32_i32 : i32
    %194 = arith.index_cast %193 : i32 to index
    %195 = memref.load %arg3[%194] : memref<72xf32, #tpu.memory_space<smem>>
    %196 = vector.broadcast %195 : f32 to vector<16x16xf32>
    %197 = arith.mulf %196, %2 : vector<16x16xf32>
    %c1_i32_33 = arith.constant 1 : i32
    %198 = arith.addi %193, %c1_i32_33 : i32
    %199 = arith.index_cast %198 : i32 to index
    %200 = memref.load %arg3[%199] : memref<72xf32, #tpu.memory_space<smem>>
    %201 = vector.broadcast %200 : f32 to vector<16x16xf32>
    %202 = arith.mulf %201, %4 : vector<16x16xf32>
    %203 = arith.addf %197, %202 : vector<16x16xf32>
    %c2_i32_34 = arith.constant 2 : i32
    %204 = arith.addi %193, %c2_i32_34 : i32
    %205 = arith.index_cast %204 : i32 to index
    %206 = memref.load %arg3[%205] : memref<72xf32, #tpu.memory_space<smem>>
    %207 = vector.broadcast %206 : f32 to vector<16x16xf32>
    %208 = arith.mulf %207, %6 : vector<16x16xf32>
    %209 = arith.addf %203, %208 : vector<16x16xf32>
    %c3_i32_35 = arith.constant 3 : i32
    %210 = arith.addi %193, %c3_i32_35 : i32
    %211 = arith.index_cast %210 : i32 to index
    %212 = memref.load %arg3[%211] : memref<72xf32, #tpu.memory_space<smem>>
    %213 = vector.broadcast %212 : f32 to vector<16x16xf32>
    %214 = arith.mulf %213, %8 : vector<16x16xf32>
    %215 = arith.addf %209, %214 : vector<16x16xf32>
    %216 = tpu.concatenate %31, %100, %169 in 0 : vector<16x16xf32>, vector<16x16xf32>, vector<16x16xf32> -> vector<48x16xf32>
    %c0_36 = arith.constant 0 : index
    %c0_37 = arith.constant 0 : index
    %c0_38 = arith.constant 0 : index
    %217 = vector.load %arg6[%c0_36, %c0_37, %c0_38] : memref<3x16x32xf32, #tpu.memory_space<vmem>>, vector<1x16x32xf32>
    %218 = vector.shape_cast %217 : vector<1x16x32xf32> to vector<16x32xf32>
    %cst = arith.constant dense<0.000000e+00> : vector<48x32xf32>
    %219 = tpu.matmul %216, %218, %cst {dimension_numbers = #tpu.dot_dimension_numbers<[1], [0], [0], [1], [0, 0, 1, 1], [], []>} : vector<48x16xf32>, vector<16x32xf32>, vector<48x32xf32> -> vector<48x32xf32>
    %220 = tpu.concatenate %54, %123, %192 in 0 : vector<16x16xf32>, vector<16x16xf32>, vector<16x16xf32> -> vector<48x16xf32>
    %c1_39 = arith.constant 1 : index
    %c0_40 = arith.constant 0 : index
    %c0_41 = arith.constant 0 : index
    %221 = vector.load %arg6[%c1_39, %c0_40, %c0_41] : memref<3x16x32xf32, #tpu.memory_space<vmem>>, vector<1x16x32xf32>
    %222 = vector.shape_cast %221 : vector<1x16x32xf32> to vector<16x32xf32>
    %cst_42 = arith.constant dense<0.000000e+00> : vector<48x32xf32>
    %223 = tpu.matmul %220, %222, %cst_42 {dimension_numbers = #tpu.dot_dimension_numbers<[1], [0], [0], [1], [0, 0, 1, 1], [], []>} : vector<48x16xf32>, vector<16x32xf32>, vector<48x32xf32> -> vector<48x32xf32>
    %224 = arith.addf %219, %223 : vector<48x32xf32>
    %225 = tpu.concatenate %77, %146, %215 in 0 : vector<16x16xf32>, vector<16x16xf32>, vector<16x16xf32> -> vector<48x16xf32>
    %c2_43 = arith.constant 2 : index
    %c0_44 = arith.constant 0 : index
    %c0_45 = arith.constant 0 : index
    %226 = vector.load %arg6[%c2_43, %c0_44, %c0_45] : memref<3x16x32xf32, #tpu.memory_space<vmem>>, vector<1x16x32xf32>
    %227 = vector.shape_cast %226 : vector<1x16x32xf32> to vector<16x32xf32>
    %cst_46 = arith.constant dense<0.000000e+00> : vector<48x32xf32>
    %228 = tpu.matmul %225, %227, %cst_46 {dimension_numbers = #tpu.dot_dimension_numbers<[1], [0], [0], [1], [0, 0, 1, 1], [], []>} : vector<48x16xf32>, vector<16x32xf32>, vector<48x32xf32> -> vector<48x32xf32>
    %229 = arith.addf %224, %228 : vector<48x32xf32>
    %c0_47 = arith.constant 0 : index
    %c0_48 = arith.constant 0 : index
    %230 = vector.load %arg5[%c0_47, %c0_48] : memref<32x48xf32, #tpu.memory_space<vmem>>, vector<32x48xf32>
    %cst_49 = arith.constant dense<0.000000e+00> : vector<32x32xf32>
    %231 = tpu.matmul %230, %229, %cst_49 {dimension_numbers = #tpu.dot_dimension_numbers<[1], [0], [0], [1], [0, 0, 1, 1], [], []>} : vector<32x48xf32>, vector<48x32xf32>, vector<32x32xf32> -> vector<32x32xf32>
    %cst_50 = arith.constant dense<0.000000e+00> : vector<32xf32>
    %232 = vector.multi_reduction <add>, %231, %cst_50 [1] : vector<32x32xf32> to vector<32xf32>
    %233 = vector.shape_cast %232 : vector<32xf32> to vector<32x1xf32>
    %cst_51 = arith.constant dense<0.000000e+00> : vector<1xf32>
    %234 = vector.multi_reduction <add>, %233, %cst_51 [0] : vector<32x1xf32> to vector<1xf32>
    %235 = vector.shape_cast %234 : vector<1xf32> to vector<1x1xf32>
    %cst_52 = arith.constant 9.765625E-4 : f32
    %236 = vector.broadcast %cst_52 : f32 to vector<1x1xf32>
    %237 = arith.mulf %235, %236 : vector<1x1xf32>
    %238 = vector.broadcast %237 : vector<1x1xf32> to vector<32x32xf32>
    %239 = arith.subf %231, %238 : vector<32x32xf32>
    %240 = arith.mulf %239, %239 : vector<32x32xf32>
    %cst_53 = arith.constant dense<0.000000e+00> : vector<32xf32>
    %241 = vector.multi_reduction <add>, %240, %cst_53 [1] : vector<32x32xf32> to vector<32xf32>
    %242 = vector.shape_cast %241 : vector<32xf32> to vector<32x1xf32>
    %cst_54 = arith.constant dense<0.000000e+00> : vector<1xf32>
    %243 = vector.multi_reduction <add>, %242, %cst_54 [0] : vector<32x1xf32> to vector<1xf32>
    %244 = vector.shape_cast %243 : vector<1xf32> to vector<1x1xf32>
    %cst_55 = arith.constant 9.765625E-4 : f32
    %245 = vector.broadcast %cst_55 : f32 to vector<1x1xf32>
    %246 = arith.mulf %244, %245 : vector<1x1xf32>
    %cst_56 = arith.constant 9.99999974E-6 : f32
    %247 = vector.broadcast %cst_56 : f32 to vector<1x1xf32>
    %248 = arith.addf %246, %247 : vector<1x1xf32>
    %249 = math.rsqrt %248 : vector<1x1xf32>
    %250 = vector.broadcast %249 : vector<1x1xf32> to vector<32x32xf32>
    %251 = arith.mulf %239, %250 : vector<32x32xf32>
    %cst_57 = arith.constant 0.000000e+00 : f32
    %252 = vector.broadcast %cst_57 : f32 to vector<32x32xf32>
    %253 = arith.maximumf %251, %252 : vector<32x32xf32>
    %c0_58 = arith.constant 0 : index
    %c0_59 = arith.constant 0 : index
    %c0_60 = arith.constant 0 : index
    %c0_61 = arith.constant 0 : index
    %254 = vector.load %arg7[%c0_58, %c0_59, %c0_60, %c0_61] : memref<1x1x32x32xf32, #tpu.memory_space<vmem>>, vector<1x1x32x32xf32>
    %255 = vector.shape_cast %254 : vector<1x1x32x32xf32> to vector<32x32xf32>
    %256 = vector.shape_cast %253 : vector<32x32xf32> to vector<1x1x32x32xf32>
    tpu.vector_store %arg7[%c0_58, %c0_59, %c0_60, %c0_61], %256 {strides = array<i32>} : memref<1x1x32x32xf32, #tpu.memory_space<vmem>>, vector<1x1x32x32xf32>,
    return
  }
  func.func @transform_0(%arg0: i32, %arg1: i32) -> (i32, i32, i32, i32) {
    %c0_i32 = arith.constant 0 : i32
    %c0_i32_0 = arith.constant 0 : i32
    %c0_i32_1 = arith.constant 0 : i32
    %c0_i32_2 = arith.constant 0 : i32
    return %arg0, %c0_i32, %c0_i32_0, %c0_i32_1 : i32, i32, i32, i32
  }
  func.func @transform_1(%arg0: i32, %arg1: i32) -> i32 {
    %c0_i32 = arith.constant 0 : i32
    %c0_i32_0 = arith.constant 0 : i32
    return %c0_i32 : i32
  }
  func.func @transform_2(%arg0: i32, %arg1: i32) -> i32 {
    %c0_i32 = arith.constant 0 : i32
    %c0_i32_0 = arith.constant 0 : i32
    return %c0_i32 : i32
  }
  func.func @transform_3(%arg0: i32, %arg1: i32) -> (i32, i32) {
    %c0_i32 = arith.constant 0 : i32
    %c0_i32_0 = arith.constant 0 : i32
    %c0_i32_1 = arith.constant 0 : i32
    return %c0_i32, %c0_i32_0 : i32, i32
  }
  func.func @transform_4(%arg0: i32, %arg1: i32) -> (i32, i32, i32) {
    %c0_i32 = arith.constant 0 : i32
    %c0_i32_0 = arith.constant 0 : i32
    %c0_i32_1 = arith.constant 0 : i32
    %c0_i32_2 = arith.constant 0 : i32
    return %c0_i32, %c0_i32_0, %c0_i32_1 : i32, i32, i32
  }
  func.func @transform_5(%arg0: i32, %arg1: i32) -> (i32, i32, i32, i32) {
    %c0_i32 = arith.constant 0 : i32
    %c0_i32_0 = arith.constant 0 : i32
    %c0_i32_1 = arith.constant 0 : i32
    return %arg0, %arg1, %c0_i32, %c0_i32_0 : i32, i32, i32, i32
  }
}

</mosaic_0001>

<bundles_post_ra>
// kernel: tpu_custom_call.1
= control target key start
LH: loop header
LB: loop body
LE: loop exit
PB: predicated region body
PF: predicated region fallthrough
CT: control target
= control target key end

     0   :  { %s2448_s0 = inlined_call_operand.hbm [shape: f32[2,4,16,16], index: 0, kind: input, shape index: {}]   ;;  %s2449_s1 = inlined_call_operand.vmem [shape: f32[72], index: 1, kind: input, shape index: {}]   ;;  %s2450_s2 = inlined_call_operand.vmem [shape: f32[2], index: 2, kind: input, shape index: {}]   ;;  %s2451_s3 = inlined_call_operand.hbm [shape: f32[32,48], index: 3, kind: input, shape index: {}]   ;;  %s2452_s4 = inlined_call_operand.hbm [shape: f32[3,16,32], index: 4, kind: input, shape index: {}]   ;;  %s2453_s5 = inlined_call_operand.hbm [shape: f32[2,2,32,32], index: 5, kind: output, shape index: {}]  }
   0x1   :  { %2468 = sst [smem:[#allocation22_spill]] %s2449_s1 }
   0x2   :  { %2469 = sst [smem:[#allocation23_spill]] %s2450_s2 }
   0x3   :  { %2470 = sst [smem:[#allocation24_spill]] %s2451_s3 }
   0x4   :  { %2471 = sst [smem:[#allocation25_spill]] %s2452_s4 }
   0x5   :  { %2472 = sst [smem:[#allocation26_spill]] %s2453_s5 }
   0x6   :  { %10 = vsyncpa [#allocation3], 0 }
   0x7   :  { %12 = vsyncpa [#allocation3 + $0x1], 0 }
   0x8   :  { %13 = vsyncpa [#allocation5], 0 }
   0x9   :  { %14 = vsyncpa [#allocation8], 0 }
   0xa   :  { %15 = vsyncpa [#allocation10], 0 }
   0xb   :  { %16 = vsyncpa [#allocation4], 0 }
   0xc   :  { %18 = vsyncpa [#allocation4 + $0x1], 0  ;;  %s1846_s18 = smov 0   ;;  %s1848_s19 = smov 0  }
   0xd   :  { %s1850_s20 = smov 0   ;;  %s1852_s21 = smov 0  }
   0xe   :  { %s1854_s22 = smov 0   ;;  %s1856_s23 = smov 0  }
   0xf   :  { %s1858_s24 = smov 0   ;;  %s1860_s25 = smov 0  }
  0x10   :  { %s1862_s26 = smov 0   ;;  %s1864_s27 = smov 0  }
  0x11   :  { %s1866_s28 = smov 0  }
  0x12 LB: > { %2473 = sst [smem:[#allocation18_spill]] %s1764_s18  ;;  %s1225_s29 = sadd.s32 4294967295, %s1804_s28   ;;  %s1804_s28 = sphi %s1866_s28, %s24_s28   ;;  %s1800_s27 = sphi %s1864_s27, %s2511_s27   ;;  %s1796_s26 = sphi %s1862_s26, %s2510_s26   ;;  %s1792_s25 = sphi %s1860_s25, %s2509_s25   ;;  %s1788_s24 = sphi %s1858_s24, %s2508_s24   ;;  %s1784_s23 = sphi %s1856_s23, %s2507_s23   ;;  %s1780_s22 = sphi %s1854_s22, %s2506_s22   ;;  %s1776_s21 = sphi %s1852_s21, %s2505_s21   ;;  %s1772_s20 = sphi %s1850_s20, %s2504_s20   ;;  %s1768_s19 = sphi %s1848_s19, %s2503_s19   ;;  %s1764_s18 = sphi %s1846_s18, %s2502_s18  }
  0x13   : > { %s1226_s30 = sadd.s32 4294967294, %s1804_s28   ;;  %p56_p0 = scmp.ne.s32.totalorder %s1780_s22, %s1776_s21 }
  0x14   : > { %p1902_p1 = scmp.eq.s32.totalorder %s1225_s29, 0  ;;  %p165_p2 = scmp.ne.s32.totalorder %s1772_s20, %s1768_s19 }
  0x15   : > { %p166_p3 = scmp.eq.s32.totalorder %s1225_s29, 3  ;;  %p171_p5 = scmp.ne.s32.totalorder %s1768_s19, %s1764_s18 }
  0x16   : > { %s2474_s6 = scalar_select %p1902_p1, 1, 0 }
  0x17   : > { %p1910_p4 = por %p1902_p1, %p56_p0  ;;  %p1916_p6 = por %p166_p3, %p165_p2 }
  0x18   : > { %p172_p7 = scmp.eq.s32.totalorder %s1226_s30, 3  ;;  %p1227_p8 = scmp.ge.s32.totalorder %s1804_s28, 1 }
  0x19   : > { %s2475_s7 = scalar_select %p1910_p4, 1, 0 }
  0x1a   : > { %s2476_s8 = scalar_select %p1916_p6, 1, 0 }
  0x1b   : > { %p179_p9 = scmp.lt.s32.totalorder %s1804_s28, 5  ;;  %p1922_p10 = por %p172_p7, %p171_p5 }
  0x1c   : > { %2477 = sst [smem:[#allocation19_spill]] %s2476_s8  ;;  %s1806_s11 = smov [#allocation9]  }
  0x1d   : > { %s2478_s9 = scalar_select %p1922_p10, 1, 0 }
  0x1e   : > { %p1926_p11 = pnand %p1227_p8, %p179_p9  ;;  %s213_s12 = sshll.u32 %s1806_s11, 4  ;;  %s214_s12 = int_to_ptr.vmem [resolvable:$true] %s213_s12 }
  0x1f   : > { %2479 = sst [smem:[#allocation20_spill]] %s2478_s9  ;;  %s2482_s3 = sld [smem:[#allocation24_spill]] }
  0x20   : > { %s2480_s10 = scalar_select %p1926_p11, 1, 0 }
  0x21   : > { %p1425_p12 = pneg %p1926_p11 }
  0x23   : > { %p1934_p13 = pnand %p1425_p12, %p1902_p1 }
  0x25   : > { %s1554_s16 = scalar_lea.hbm %s2482_s3, 512  ;;  %p1946_p2 = pneg %p1934_p13 }
  0x26   : > { %p1555_p0 = scmp.ne.s32.totalorder %s2482_s3, %s1554_s16  ;;  %p1561_p7 = scmp.lt.u32.totalorder %s1554_s16, %s2482_s3 }
  0x28   : > { %p1557_p3 = pnand %p1946_p2, %p1555_p0 }
  0x2a   : > { %p1558_p5 = pneg %p1557_p3 }
  0x2c   : > { %p1563_p8 = pnand %p1561_p7, %p1558_p5 }
  0x2e   : > { %1566 = shalt.err (!%p1563_p8)
}
  0x2f   : > { %s1567_s14 = scalar_lea.vmem %s214_s12, 512  ;;  %p1575_p6 = scmp.lt.s32.totalorder %s214_s12, %s214_s12 }
  0x30   : > { %p1568_p9 = scmp.ne.s32.totalorder %s214_s12, %s1567_s14  ;;  %p1576_p1 = scmp.lt.s32.totalorder %s1567_s14, %s1567_s14 }
  0x32   : > { %p1570_p12 = pnand %p1568_p9, %p1946_p2  ;;  %p1577_p4 = por %p1576_p1, %p1575_p6 }
  0x34   : > { %p1571_p10 = pneg %p1570_p12 }
  0x36   : > { %p1578_p11 = pnand %p1577_p4, %p1571_p10 }
  0x38   : > { %1581 = shalt.err (!%p1578_p11)
}
  0x39   : > { %s2464_s15 = smov 128   ;;  %s2466_s17 = smov 8  }
  0x3a   : > { %1434 = dma.hbm_to_vmem [thread:$0]  (!%p1934_p13), %s2482_s3, 512, %s214_s12, [#allocation10], %s2464_s15, %s2464_s15, %s2466_s17  }
  0x3b   : > { %s2484_s1 = sld [smem:[#allocation22_spill]]  ;;  %s2485_s2 = sld [smem:[#allocation23_spill]] }
  0x41   : > { %s192_s9 = sshll.u32 %s2484_s1, 4  ;;  %s203_s5 = sshll.u32 %s2485_s2, 4  ;;  %s193_s9 = int_to_ptr.vmem [resolvable:$true] %s192_s9  ;;  %s204_s5 = int_to_ptr.vmem [resolvable:$true] %s203_s5 }
  0x42   : > { %s1582_s8 = scalar_lea.vmem %s193_s9, 16  ;;  %p1590_p10 = scmp.lt.s32.totalorder %s193_s9, %s193_s9 }
  0x43   : > { %p1583_p1 = scmp.ne.s32.totalorder %s193_s9, %s1582_s8  ;;  %p1591_p11 = scmp.lt.s32.totalorder %s1582_s8, %s1582_s8 }
  0x45   : > { %p1585_p4 = pnand %p1583_p1, %p1946_p2  ;;  %p1592_p0 = por %p1591_p11, %p1590_p10 }
  0x47   : > { %p1586_p6 = pneg %p1585_p4 }
  0x49   : > { %p1593_p3 = pnand %p1592_p0, %p1586_p6 }
  0x4b   : > { %1596 = shalt.err (!%p1593_p3)
}
  0x4c   : > { %s1809_s12 = smov [#allocation6]   ;;  %s1597_s16 = scalar_lea.vmem %s204_s5, 16 }
  0x4d   : > { %1428 = dma.vmem_to_smem (!%p1934_p13), %s193_s9, 16, %s1809_s12, [#allocation5]  }
  0x4e   : > { %p1598_p5 = scmp.ne.s32.totalorder %s204_s5, %s1597_s16  ;;  %p1605_p9 = scmp.lt.s32.totalorder %s204_s5, %s204_s5 }
  0x4f   : > { %p1606_p12 = scmp.lt.s32.totalorder %s1597_s16, %s1597_s16 }
  0x50   : > { %p1600_p7 = pnand %p1598_p5, %p1946_p2 }
  0x51   : > { %p1607_p1 = por %p1606_p12, %p1605_p9 }
  0x52   : > { %p1601_p8 = pneg %p1600_p7 }
  0x54   : > { %p1608_p4 = pnand %p1607_p1, %p1601_p8 }
  0x56   : > { %1611 = shalt.err (!%p1608_p4)
}
  0x57   : > { %s1810_s18 = smov [#allocation7]   ;;  %s1811_s8 = smov [#allocation11]  }
  0x58   : > { %1431 = dma.vmem_to_smem (!%p1934_p13), %s204_s5, 16, %s1810_s18, [#allocation8]  }
  0x59   : > { %s226_s21 = sshll.u32 %s1811_s8, 4  ;;  %s2486_s4 = sld [smem:[#allocation25_spill]]  ;;  %s227_s21 = int_to_ptr.vmem [resolvable:$true] %s226_s21 }
  0x5f   : > { %s1612_s11 = scalar_lea.hbm %s2486_s4, 768 }
  0x60   : > { %p1613_p6 = scmp.ne.s32.totalorder %s2486_s4, %s1612_s11  ;;  %p1619_p0 = scmp.lt.u32.totalorder %s1612_s11, %s2486_s4 }
  0x62   : > { %p1615_p10 = pnand %p1613_p6, %p1946_p2 }
  0x64   : > { %p1616_p11 = pneg %p1615_p10 }
  0x66   : > { %p1621_p3 = pnand %p1619_p0, %p1616_p11 }
  0x68   : > { %1624 = shalt.err (!%p1621_p3)
}
  0x69   : > { %s1625_s5 = scalar_lea.vmem %s227_s21, 768  ;;  %p1633_p9 = scmp.lt.s32.totalorder %s227_s21, %s227_s21 }
  0x6a   : > { %p1626_p5 = scmp.ne.s32.totalorder %s227_s21, %s1625_s5  ;;  %p1634_p12 = scmp.lt.s32.totalorder %s1625_s5, %s1625_s5 }
  0x6c   : > { %p1628_p7 = pnand %p1626_p5, %p1946_p2  ;;  %p1635_p1 = por %p1634_p12, %p1633_p9 }
  0x6e   : > { %p1629_p8 = pneg %p1628_p7 }
  0x70   : > { %p1636_p4 = pnand %p1635_p1, %p1629_p8 }
  0x72   : > { %1639 = shalt.err (!%p1636_p4)
}
  0x73   : > { %s2487_s18 = smov 128   ;;  %s33_s13 = sadd.s32 1, %s1796_s26 }
  0x74   : > { %1437 = dma.hbm_to_vmem [thread:$0]  (!%p1934_p13), %s2486_s4, 768, %s227_s21, [#allocation10], %s2487_s18, %s2487_s18, %s2466_s17  }
  0x75   : > { %p34_p2 = scmp.ge.s32.totalorder %s33_s13, 2  ;;  %s36_s29 = sadd.s32 1, %s1800_s27 }
  0x76   : > { %s43_s9 = sadd.s32 1, %s1784_s23  ;;  %p50_p6 = scmp.ne.s32.totalorder %s1784_s23, %s1780_s22 }
  0x77   : > { %s2513_s13 = smov (%p34_p2, %s33_s13), 0  ;;  %s2515_s29 = smov (!%p34_p2, %s36_s29), %s1800_s27 }
  0x78   : > { %2488 = sst [smem:[#allocation21_spill]] %s2513_s13  ;;  %p51_p10 = scmp.eq.s32.totalorder %s1804_s28, 0 }
  0x79   : > { %s151_s30 = ssub.s32 %s1796_s26, %s2513_s13  ;;  %p38_p11 = scmp.ge.s32.totalorder %s2515_s29, 2 }
  0x7a   : > { %s155_s11 = sadd.s32 1, %s1772_s20  ;;  %p2012_p0 = por %p51_p10, %p50_p6 }
  0x7b   : > { %p1450_p13 = scmp.lt.s32.totalorder %s1804_s28, 4  ;;  %s2517_s29 = smov (%p38_p11, %s2515_s29), 0 }
  0x7c   : > { %s240_s14 = sand.u32 1, %s1784_s23   ;;  %s1277_s12 = sshll.u32 %s1800_s27, 10 }
  0x7d   : > { %s40_s16 = ssub.s32 %s1800_s27, %s2517_s29  ;;  %s1233_s15 = sshll.u32 %s240_s14, 6 }
  0x7e   : > { %p41_p3 = scmp.eq.s32.totalorder %s40_s16, 0  ;;  %s152_s5 = sor.u32 %s151_s30, %s40_s16 }
  0x7f   : > { %p153_p5 = scmp.eq.s32.totalorder %s152_s5, 0  ;;  %s2032_s3 = scalar_lea.hbm %s2448_s0, %s1277_s12 }
  0x80   : > { %s2024_s8 = scalar_select %p41_p3, %s1784_s23, %s43_s9  }
  0x81   : > { %s2027_s17 = scalar_select %p153_p5, %s1772_s20, %s155_s11  }
  0x82   : > { %s244_s4 = scalar_lea.vmem [#allocation2], %s1233_s15  ;;  %p2038_p7 = pnand %p1450_p13, %p2012_p0 }
  0x83   : > { %s251_s13 = sshll.u32 %s244_s4, 4  ;;  %s2044_s9 = scalar_lea.sflag [#allocation3], %s240_s14  ;;  %s2042_s13 = int_to_ptr.vmem [resolvable:$true] %s251_s13 }
  0x84   : > { %s1640_s1 = scalar_lea.hbm %s2032_s3, 1024  ;;  %p1642_p9 = pneg %p2038_p7 }
  0x85   : > { %p1641_p8 = scmp.ne.s32.totalorder %s2032_s3, %s1640_s1  ;;  %s1645_s11 = scalar_lea.hbm %s2448_s0, 2048 }
  0x86   : > { %p1646_p4 = scmp.lt.u32.totalorder %s2032_s3, %s2448_s0  ;;  %p1647_p2 = scmp.lt.u32.totalorder %s1645_s11, %s1640_s1 }
  0x87   : > { %p1643_p12 = pnand %p1642_p9, %p1641_p8  ;;  %p1649_p10 = scmp.lt.u32.totalorder %s1640_s1, %s2032_s3 }
  0x88   : > { %p1648_p6 = por %p1647_p2, %p1646_p4 }
  0x89   : > { %p1644_p1 = pneg %p1643_p12 }
  0x8a   : > { %p1650_p11 = por %p1649_p10, %p1648_p6 }
  0x8c   : > { %p1651_p0 = pnand %p1650_p11, %p1644_p1 }
  0x8e   : > { %1654 = shalt.err (!%p1651_p0)
}
  0x8f   : > { %s1655_s14 = scalar_lea.vmem %s2042_s13, 1024  ;;  %s1812_s16 = smov [#allocation2]  }
  0x90   : > { %p1656_p13 = scmp.ne.s32.totalorder %s2042_s13, %s1655_s14  ;;  %s1660_s5 = sshll.u32 %s1812_s16, 4  ;;  %s1661_s5 = int_to_ptr.vmem [resolvable:$false] %s1660_s5 }
  0x91   : > { %s1662_s15 = scalar_lea.vmem %s1661_s5, 2048  ;;  %p1663_p8 = scmp.lt.s32.totalorder %s2042_s13, %s1661_s5 }
  0x92   : > { %p1658_p3 = pnand %p1656_p13, %p1642_p9  ;;  %p1664_p12 = scmp.lt.s32.totalorder %s1662_s15, %s1655_s14 }
  0x94   : > { %p1659_p5 = pneg %p1658_p3  ;;  %p1665_p4 = por %p1664_p12, %p1663_p8 }
  0x96   : > { %p1666_p2 = pnand %p1665_p4, %p1659_p5 }
  0x98   : > { %1669 = shalt.err (!%p1666_p2)
}
  0x99   : > { %s2491_s1 = smov 8   ;;  %p2492_p9 = scmp.ne.s32.totalorder %s2480_s10, 0 }
  0x9a   : > { %1441 = dma.hbm_to_vmem [thread:$0]  (!%p2038_p7), %s2032_s3, 1024, %s2042_s13, %s2044_s9, %s2487_s18, %s2487_s18, %s2491_s1  }
  0x9b   : > { %263 = sbr.rel (%p2492_p9) target bundleno = 1031 (0x407), region = 40  ;;  %s265_s2 = sand.u32 (!%p2492_p9), 1, %s1780_s22  }
  0x9c   : > { %s1237_s4 = sshll.u32 (!%p2492_p9), %s265_s2, 6  ;;  %s266_s11 = scalar_lea.sflag (!%p2492_p9), [#allocation3], %s265_s2 }
  0x9d   : > { %s2078_s21 = scalar_lea.vmem (!%p2492_p9), [#allocation2], %s1237_s4  ;;  %p2493_p1 = scmp.ne.s32.totalorder (!%p2492_p9), %s2475_s7, 0 }
  0xa2   : > { %1743 = dma.done.wait (%p2493_p1), %s266_s11, 1024  }
  0xa3   : > { %1745 = vsyncadd (%p2493_p1), %s266_s11, 4294966272  ;;  %p2494_p6 = scmp.ne.s32.totalorder %s2474_s6, 0 }
  0xa5   : > { %1747 = dma.done.wait (%p2494_p6), [#allocation5], 16  }
  0xa6   : > { %1749 = vsyncadd (%p2494_p6), [#allocation5], 4294967280 }
  0xa7   : > { %1751 = dma.done.wait (%p2494_p6), [#allocation8], 16  }
  0xa8   : > { %1753 = vsyncadd (%p2494_p6), [#allocation8], 4294967280 }
  0xa9   : > { %1755 = dma.done.wait (%p2494_p6), [#allocation10], 1280  }
  0xaa   : > { %1757 = vsyncadd (%p2494_p6), [#allocation10], 4294966016 }
  0xab   : > { %290 = sfence }
  0xac   : > { %v558_v0 = vld [vmem:[#allocation11] sm:$0xff]  ;;  %v559_v1 = vld [vmem:[#allocation11 + $0x8] sm:$0xff]  ;;  %s2097_s3 = smul.u32 36, %s1788_s24  ;;  %v561_v6 = vld [vmem:[#allocation11 + $0x10] sm:$0xff]  ;;  %vm563_vm0 = vcmask 130048   ;;  %vm916_vm1 = vcmask 392192  }
  0xad   : > { %v1373_v2 = vpack.c.bf16 %v559_v1, %v558_v0  ;;  %v791_v3 = vld [vmem:[#allocation11 + $0x20] sm:$0xff]  ;;  %v792_v4 = vld [vmem:[#allocation11 + $0x28] sm:$0xff]  ;;  %v562_v7 = vld [vmem:[#allocation11 + $0x18] sm:$0xff]  ;;  %vm1014_vm2 = vcmask 261120  }
  0xae   : > { %s2100_s7 = sld [smem:[#allocation6 + %s2097_s3]]  ;;  %s329_s10 = sadd.s32 1, %s2097_s3  ;;  %v2109_v5 = vpack.c.bf16 %v792_v4, %v791_v3  ;;  %v1369_v8 = vpack.c.bf16 %v562_v7, %v561_v6  ;;  %v2115_v9 = vld [vmem:[%s2078_s21] sm:$0xff]  ;;  %v2118_v10 = vld [vmem:[%s2078_s21 + $0x8] sm:$0xff]  ;;  %v2125_v11 = vld [vmem:[%s2078_s21 + $0x10] sm:$0xff] }
  0xaf   : > { %1374 = vmatprep.subr.bf16.mxu0 %v1373_v2  ;;  %s2103_s6 = sld [smem:[#allocation6 + %s329_s10]]  ;;  %s336_s18 = sadd.s32 2, %s2097_s3  ;;  %v2128_v12 = vld [vmem:[%s2078_s21 + $0x18] sm:$0xff]  ;;  %v2134_v13 = vld [vmem:[%s2078_s21 + $0x20] sm:$0xff]  ;;  %v2137_v14 = vld [vmem:[%s2078_s21 + $0x28] sm:$0xff] }
  0xb0   : > { %1376 = vmatpush3.bf16.msra.mxu0 %v1373_v2  ;;  %s2106_s13 = sld [smem:[#allocation6 + %s336_s18]]  ;;  %s343_s30 = sadd.s32 3, %s2097_s3  ;;  %1370 = vmatprep.subr.bf16.mxu1 %v1369_v8  ;;  %v2144_v16 = vld [vmem:[%s2078_s21 + $0x30] sm:$0xff]  ;;  %v2147_v17 = vld [vmem:[%s2078_s21 + $0x38] sm:$0xff] }
  0xb1   : > { %s2111_s9 = sld [smem:[#allocation6 + %s343_s30]]  ;;  %s402_s12 = sadd.s32 12, %s2097_s3  ;;  %1378 = vmatprep.subr.bf16.mxu0 %v2109_v5  ;;  %1372 = vmatpush3.bf16.msra.mxu1 %v1369_v8 }
  0xb2   : > { %s2121_s14 = sld [smem:[#allocation6 + %s402_s12]]  ;;  %s407_s16 = sadd.s32 13, %s2097_s3 }
  0xb3   : > { %s2130_s5 = sld [smem:[#allocation6 + %s407_s16]]  ;;  %s414_s15 = sadd.s32 14, %s2097_s3 }
  0xb4   : > { %v326_v15 = vstv %s2100_s7  ;;  %s2140_s1 = sld [smem:[#allocation6 + %s414_s15]]  ;;  %s421_s2 = sadd.s32 15, %s2097_s3 }
  0xb5   : > { %v327_v18 = vmul.f32 %v326_v15, %v2115_v9  ;;  %v328_v19 = vmul.f32 %v326_v15, %v2118_v10  ;;  %v331_v20 = vstv %s2103_s6  ;;  %s2152_s4 = sld [smem:[#allocation6 + %s421_s2]]  ;;  %s480_s11 = sadd.s32 24, %s2097_s3 }
  0xb6   : > { %v332_v21 = vmul.f32 %v2125_v11, %v331_v20  ;;  %v333_v22 = vmul.f32 %v2128_v12, %v331_v20  ;;  %v338_v23 = vstv %s2106_s13  ;;  %s2158_s7 = sld [smem:[#allocation6 + %s480_s11]]  ;;  %s485_s21 = sadd.s32 25, %s2097_s3 }
  0xb7   : > { %v339_v24 = vmul.f32 %v2134_v13, %v338_v23  ;;  %v340_v25 = vmul.f32 %v2137_v14, %v338_v23  ;;  %v345_v26 = vstv %s2111_s9  ;;  %s2164_s10 = sld [smem:[#allocation6 + %s485_s21]]  ;;  %s492_s6 = sadd.s32 26, %s2097_s3 }
  0xb8   : > { %v334_v27 = vadd.f32 %v332_v21, %v327_v18  ;;  %v346_v28 = vmul.f32 %v2144_v16, %v345_v26  ;;  %v347_v29 = vmul.f32 %v2147_v17, %v345_v26  ;;  %v335_v30 = vadd.f32 %v333_v22, %v328_v19  ;;  %s2169_s18 = sld [smem:[#allocation6 + %s492_s6]]  ;;  %s499_s13 = sadd.s32 27, %s2097_s3 }
  0xb9   : > { %v404_v31 = vstv %s2121_s14  ;;  %v409_v32 = vstv %s2130_s5  ;;  %s2174_s30 = sld [smem:[#allocation6 + %s499_s13]]  ;;  %s350_s9 = sadd.s32 4, %s2097_s3 }
  0xba   : > { %v341_v33 = vadd.f32 %v339_v24, %v334_v27  ;;  %v342_v34 = vadd.f32 %v340_v25, %v335_v30  ;;  %v405_v35 = vmul.f32 %v404_v31, %v2115_v9  ;;  %v410_v36 = vmul.f32 %v2125_v11, %v409_v32  ;;  %s2179_s12 = sld [smem:[#allocation6 + %s350_s9]]  ;;  %s355_s16 = sadd.s32 5, %s2097_s3 }
  0xbb   : > { %v416_v37 = vstv %s2140_s1  ;;  %v423_v38 = vstv %s2152_s4  ;;  %v406_v39 = vmul.f32 %v404_v31, %v2118_v10  ;;  %v411_v40 = vmul.f32 %v2128_v12, %v409_v32  ;;  %s2186_s14 = sld [smem:[#allocation6 + %s355_s16]]  ;;  %s362_s5 = sadd.s32 6, %s2097_s3 }
  0xbc   : > { %v348_v41 = vadd.f32 %v346_v28, %v341_v33  ;;  %v349_v42 = vadd.f32 %v347_v29, %v342_v34  ;;  %v412_v43 = vadd.f32 %v410_v36, %v405_v35  ;;  %v417_v44 = vmul.f32 %v2134_v13, %v416_v37  ;;  %s2190_s15 = sld [smem:[#allocation6 + %s362_s5]]  ;;  %s369_s1 = sadd.s32 7, %s2097_s3 }
  0xbd   : > { %v424_v45 = vmul.f32 %v2144_v16, %v423_v38  ;;  %v413_v46 = vadd.f32 %v411_v40, %v406_v39  ;;  %v418_v47 = vmul.f32 %v2137_v14, %v416_v37  ;;  %v425_v48 = vmul.f32 %v2147_v17, %v423_v38  ;;  %s2196_s2 = sld [smem:[#allocation6 + %s369_s1]]  ;;  %s376_s4 = sadd.s32 8, %s2097_s3 }
  0xbe   : > { %1329 = vmatprep.mubr.msk.f32.mxu0 %vm563_vm0, %v348_v41  ;;  %v419_v49 = vadd.f32 %v417_v44, %v412_v43  ;;  %v482_v50 = vstv %s2158_s7  ;;  %v487_v51 = vstv %s2164_s10  ;;  %v494_v52 = vstv %s2169_s18  ;;  %s2203_s11 = sld [smem:[#allocation6 + %s376_s4]]  ;;  %s381_s21 = sadd.s32 9, %s2097_s3 }
  0xbf   : > { %1330 = vmatmul.mubr.msk.f32.vlgmr.msra.gmra.mrb[0].mxu0 %vm563_vm0, %v349_v42  ;;  %v420_v53 = vadd.f32 %v418_v47, %v413_v46  ;;  %v483_v54 = vmul.f32 %v482_v50, %v2115_v9  ;;  %v488_v55 = vmul.f32 %v2125_v11, %v487_v51  ;;  %v495_v56 = vmul.f32 %v2134_v13, %v494_v52  ;;  %s2210_s6 = sld [smem:[#allocation6 + %s381_s21]]  ;;  %s388_s13 = sadd.s32 10, %s2097_s3 }
  0xc0   : > { %1380 = vmatpush3.bf16.msra.mxu0 %v2109_v5  ;;  %v426_v57 = vadd.f32 %v424_v45, %v419_v49  ;;  %v501_v58 = vstv %s2174_s30  ;;  %v484_v59 = vmul.f32 %v482_v50, %v2118_v10  ;;  %v489_v60 = vmul.f32 %v2128_v12, %v487_v51  ;;  %s2217_s7 = sld [smem:[#allocation6 + %s388_s13]]  ;;  %s395_s10 = sadd.s32 11, %s2097_s3 }
  0xc1   : > { %v427_v61 = vadd.f32 %v425_v48, %v420_v53  ;;  %v490_v62 = vadd.f32 %v488_v55, %v483_v54  ;;  %v502_v63 = vmul.f32 %v2144_v16, %v501_v58  ;;  %v496_v0 = vmul.f32 %v2137_v14, %v494_v52  ;;  %s2222_s18 = sld [smem:[#allocation6 + %s395_s10]]  ;;  %s428_s9 = sadd.s32 16, %s2097_s3 }
  0xc2   : > { %1332 = vmatprep.mubr.msk.f32.mxu0 %vm563_vm0, %v426_v57  ;;  %v491_v1 = vadd.f32 %v489_v60, %v484_v59  ;;  %v503_v2 = vmul.f32 %v2147_v17, %v501_v58  ;;  %v352_v3 = vstv %s2179_s12  ;;  %v357_v4 = vstv %s2186_s14  ;;  %s2229_s30 = sld [smem:[#allocation6 + %s428_s9]]  ;;  %s433_s16 = sadd.s32 17, %s2097_s3 }
  0xc3   : > { %1333 = vmatmul.mubr.msk.f32.gmra.mrb[2].mxu0 %vm563_vm0, %v427_v61  ;;  %v497_v5 = vadd.f32 %v495_v56, %v490_v62  ;;  %v353_v6 = vmul.f32 %v352_v3, %v2115_v9  ;;  %v354_v7 = vmul.f32 %v352_v3, %v2118_v10  ;;  %v358_v8 = vmul.f32 %v2125_v11, %v357_v4  ;;  %s2236_s5 = sld [smem:[#allocation6 + %s433_s16]]  ;;  %s440_s1 = sadd.s32 18, %s2097_s3 }
  0xc4   : > { %v498_v15 = vadd.f32 %v496_v0, %v491_v1  ;;  %v359_v18 = vmul.f32 %v2128_v12, %v357_v4  ;;  %v364_v19 = vstv %s2190_s15  ;;  %v371_v20 = vstv %s2196_s2  ;;  %s2242_s12 = sld [smem:[#allocation6 + %s440_s1]]  ;;  %s447_s14 = sadd.s32 19, %s2097_s3 }
  0xc5   : > { %v504_v21 = vadd.f32 %v502_v63, %v497_v5  ;;  %v360_v22 = vadd.f32 %v358_v8, %v353_v6  ;;  %v365_v23 = vmul.f32 %v2134_v13, %v364_v19  ;;  %v366_v24 = vmul.f32 %v2137_v14, %v364_v19  ;;  %s2247_s4 = sld [smem:[#allocation6 + %s447_s14]]  ;;  %s454_s21 = sadd.s32 20, %s2097_s3 }
  0xc6   : > { %v505_v25 = vadd.f32 %v503_v2, %v498_v15  ;;  %v372_v26 = vmul.f32 %v2144_v16, %v371_v20  ;;  %v373_v27 = vmul.f32 %v2147_v17, %v371_v20  ;;  %v361_v28 = vadd.f32 %v359_v18, %v354_v7  ;;  %s2252_s15 = sld [smem:[#allocation6 + %s454_s21]]  ;;  %s459_s2 = sadd.s32 21, %s2097_s3 }
  0xc7   : > { %1335 = vmatprep.mubr.msk.f32.mxu0 %vm563_vm0, %v504_v21  ;;  %v367_v29 = vadd.f32 %v365_v23, %v360_v22  ;;  %v378_v30 = vstv %s2203_s11  ;;  %v383_v31 = vstv %s2210_s6  ;;  %v390_v32 = vstv %s2217_s7  ;;  %s2259_s13 = sld [smem:[#allocation6 + %s459_s2]]  ;;  %s466_s10 = sadd.s32 22, %s2097_s3 }
  0xc8   : > { %1336 = vmatmul.mubr.msk.f32.gmra.mrb[4].mxu0 %vm563_vm0, %v505_v25  ;;  %v368_v33 = vadd.f32 %v366_v24, %v361_v28  ;;  %v379_v34 = vmul.f32 %v378_v30, %v2115_v9  ;;  %v380_v35 = vmul.f32 %v378_v30, %v2118_v10  ;;  %v384_v36 = vmul.f32 %v2125_v11, %v383_v31  ;;  %s2266_s9 = sld [smem:[#allocation6 + %s466_s10]]  ;;  %s473_s11 = sadd.s32 23, %s2097_s3 }
  0xc9   : > { %v374_v37 = vadd.f32 %v372_v26, %v367_v29  ;;  %v385_v38 = vmul.f32 %v2128_v12, %v383_v31  ;;  %v391_v39 = vmul.f32 %v2134_v13, %v390_v32  ;;  %v392_v40 = vmul.f32 %v2137_v14, %v390_v32  ;;  %s2272_s6 = sld [smem:[#allocation6 + %s473_s11]]  ;;  %s506_s7 = sadd.s32 28, %s2097_s3 }
  0xca   : > { %v375_v41 = vadd.f32 %v373_v27, %v368_v33  ;;  %v386_v42 = vadd.f32 %v384_v36, %v379_v34  ;;  %v397_v43 = vstv %s2222_s18  ;;  %v430_v44 = vstv %s2229_s30  ;;  %s511_s16 = sadd.s32 29, %s2097_s3  ;;  %s2282_s1 = sld [smem:[#allocation6 + %s506_s7]] }
  0xcb   : > { %1316 = vmatprep.mubr.msk.f32.mxu1 %vm563_vm0, %v374_v37  ;;  %v387_v45 = vadd.f32 %v385_v38, %v380_v35  ;;  %v398_v46 = vmul.f32 %v2144_v16, %v397_v43  ;;  %v399_v47 = vmul.f32 %v2147_v17, %v397_v43  ;;  %v431_v48 = vmul.f32 %v430_v44, %v2115_v9  ;;  %s518_s14 = sadd.s32 30, %s2097_s3  ;;  %s2289_s18 = sld [smem:[#allocation6 + %s511_s16]] }
  0xcc   : > { %1317 = vmatmul.mubr.msk.f32.vlgmr.msra.gmra.mrb[0].mxu1 %vm563_vm0, %v375_v41  ;;  %v393_v49 = vadd.f32 %v391_v39, %v386_v42  ;;  %v435_v50 = vstv %s2236_s5  ;;  %v442_v51 = vstv %s2242_s12  ;;  %v449_v52 = vstv %s2247_s4  ;;  %s525_s30 = sadd.s32 31, %s2097_s3  ;;  %s2295_s21 = sld [smem:[#allocation6 + %s518_s14]] }
  0xcd   : > { %v394_v53 = vadd.f32 %v392_v40, %v387_v45  ;;  %v436_v54 = vmul.f32 %v2125_v11, %v435_v50  ;;  %v443_v55 = vmul.f32 %v2134_v13, %v442_v51  ;;  %v450_v56 = vmul.f32 %v2144_v16, %v449_v52  ;;  %s532_s2 = sadd.s32 32, %s2097_s3  ;;  %s2301_s5 = sld [smem:[#allocation6 + %s525_s30]] }
  0xce   : > { %v400_v57 = vadd.f32 %v398_v46, %v393_v49  ;;  %v432_v58 = vmul.f32 %v430_v44, %v2118_v10  ;;  %v437_v59 = vmul.f32 %v2128_v12, %v435_v50  ;;  %v444_v60 = vmul.f32 %v2137_v14, %v442_v51  ;;  %s537_s12 = sadd.s32 33, %s2097_s3  ;;  %s544_s4 = sadd.s32 34, %s2097_s3 }
  0xcf   : > { %v401_v61 = vadd.f32 %v399_v47, %v394_v53  ;;  %v438_v62 = vadd.f32 %v436_v54, %v431_v48  ;;  %v451_v63 = vmul.f32 %v2147_v17, %v449_v52  ;;  %v456_v0 = vstv %s2252_s15  ;;  %s2311_s10 = sld [smem:[#allocation6 + %s532_s2]]  ;;  %s551_s11 = sadd.s32 35, %s2097_s3 }
  0xd0   : > { %1342 = vmatprep.mubr.msk.f32.mxu0 %vm563_vm0, %v400_v57  ;;  %v439_v1 = vadd.f32 %v437_v59, %v432_v58  ;;  %v457_v2 = vmul.f32 %v456_v0, %v2115_v9  ;;  %v461_v3 = vstv %s2259_s13  ;;  %v468_v4 = vstv %s2266_s9  ;;  %s2318_s15 = sld [smem:[#allocation6 + %s537_s12]]  ;;  %s310_s9 = sand.u32 1, %s1768_s19  }
  0xd1   : > { %1343 = vmatmul.mubr.msk.f32.vlgmr.msra.gmra.mrb[0].mxu0 %vm563_vm0, %v401_v61  ;;  %v445_v5 = vadd.f32 %v443_v55, %v438_v62  ;;  %v462_v6 = vmul.f32 %v2125_v11, %v461_v3  ;;  %v469_v7 = vmul.f32 %v2134_v13, %v468_v4  ;;  %v475_v8 = vstv %s2272_s6  ;;  %s2323_s3 = sld [smem:[#allocation6 + %s544_s4]]  ;;  %s1242_s6 = sshll.u32 %s310_s9, 5 }
  0xd2   : > { %v446_v15 = vadd.f32 %v444_v60, %v439_v1  ;;  %v476_v18 = vmul.f32 %v2144_v16, %v475_v8  ;;  %v458_v19 = vmul.f32 %v456_v0, %v2118_v10  ;;  %v463_v20 = vmul.f32 %v2128_v12, %v461_v3  ;;  %s2325_s13 = sld [smem:[#allocation6 + %s551_s11]]  ;;  %s1272_s7 = sshll.u32 %s1788_s24, 2 }
  0xd3   : > { %v452_v21 = vadd.f32 %v450_v56, %v445_v5  ;;  %v464_v22 = vadd.f32 %v462_v6, %v457_v2  ;;  %v470_v23 = vmul.f32 %v2137_v14, %v468_v4  ;;  %v477_v24 = vmul.f32 %v2147_v17, %v475_v8  ;;  %s1273_s16 = sshll.u32 %s1792_s25, 3  ;;  %s2496_s12 = sld [smem:[#allocation26_spill]] }
  0xd4   : > { %v453_v25 = vadd.f32 %v451_v63, %v446_v15  ;;  %v465_v26 = vadd.f32 %v463_v20, %v458_v19  ;;  %v508_v27 = vstv %s2282_s1  ;;  %v513_v28 = vstv %s2289_s18  ;;  %s1094_s1 = sadd.s32 %s1273_s16, %s1272_s7  ;;  %s312_s18 = scalar_lea.vmem [#allocation12], %s1242_s6 }
  0xd5   : > { %1319 = vmatprep.mubr.msk.f32.mxu1 %vm563_vm0, %v452_v21  ;;  %v471_v29 = vadd.f32 %v469_v7, %v464_v22  ;;  %v509_v30 = vmul.f32 %v508_v27, %v2115_v9  ;;  %v514_v31 = vmul.f32 %v2125_v11, %v513_v28  ;;  %v520_v32 = vstv %s2295_s21  ;;  %s1274_s14 = sshll.u32 %s1094_s1, 7  ;;  %s1097_s30 = sshll.u32 %s312_s18, 4  ;;  %s2381_s30 = int_to_ptr.vmem [resolvable:$true] %s1097_s30 }
  0xd6   : > { %1320 = vmatmul.mubr.msk.f32.gmra.mrb[2].mxu1 %vm563_vm0, %v453_v25  ;;  %v472_v33 = vadd.f32 %v470_v23, %v465_v26  ;;  %v521_v34 = vmul.f32 %v2134_v13, %v520_v32  ;;  %v527_v35 = vstv %s2301_s5  ;;  %v510_v36 = vmul.f32 %v508_v27, %v2118_v10  ;;  %v913_v25 = vld [vmem:[#allocation9 + $0x8] sm:$0xff]  ;;  %v914_v26 = vld [vmem:[#allocation9 + $0x10] sm:$0xff]  ;;  %v915_v27 = vld [vmem:[#allocation9 + $0x18] sm:$0xff]  ;;  %s2495_s21 = sld [smem:[#allocation19_spill]]  ;;  %s2387_s24 = scalar_lea.sflag [#allocation4], %s310_s9 }
  0xd7   : > { %v478_v37 = vadd.f32 %v476_v18, %v471_v29  ;;  %v516_v38 = vadd.f32 %v514_v31, %v509_v30  ;;  %v528_v39 = vmul.f32 %v2144_v16, %v527_v35  ;;  %v515_v40 = vmul.f32 %v2128_v12, %v513_v28  ;;  %s1670_s25 = scalar_lea.vmem %s2381_s30, 512 }
  0xd8   : > { %v479_v41 = vadd.f32 %v477_v24, %v472_v33  ;;  %v522_v42 = vmul.f32 %v2137_v14, %v520_v32  ;;  %v529_v43 = vmul.f32 %v2147_v17, %v527_v35  ;;  %v534_v44 = vstv %s2311_s10  ;;  %p1671_p7 = scmp.ne.s32.totalorder %s2381_s30, %s1670_s25  ;;  %s1813_s10 = smov [#allocation12]  }
  0xd9   : > { %1345 = vmatprep.mubr.msk.f32.mxu0 %vm563_vm0, %v478_v37  ;;  %v523_v45 = vadd.f32 %v521_v34, %v516_v38  ;;  %v517_v46 = vadd.f32 %v515_v40, %v510_v36  ;;  %v535_v47 = vmul.f32 %v534_v44, %v2115_v9  ;;  %v539_v48 = vstv %s2318_s15  ;;  %s2379_s4 = scalar_lea.hbm %s2496_s12, %s1274_s14  ;;  %s1674_s11 = sshll.u32 %s1813_s10, 4  ;;  %s1675_s11 = int_to_ptr.vmem [resolvable:$false] %s1674_s11 }
  0xda   : > { %1346 = vmatmul.mubr.msk.f32.gmra.mrb[2].mxu0 %vm563_vm0, %v479_v41  ;;  %v540_v49 = vmul.f32 %v2125_v11, %v539_v48  ;;  %v546_v50 = vstv %s2323_s3  ;;  %v553_v51 = vstv %s2325_s13  ;;  %v536_v52 = vmul.f32 %v534_v44, %v2118_v10  ;;  %s1676_s15 = scalar_lea.vmem %s1675_s11, 1024  ;;  %p1677_p13 = scmp.lt.s32.totalorder %s2381_s30, %s1675_s11 }
  0xdb   : > { %v530_v53 = vadd.f32 %v528_v39, %v523_v45  ;;  %v524_v54 = vadd.f32 %v522_v42, %v517_v46  ;;  %v547_v55 = vmul.f32 %v2134_v13, %v546_v50  ;;  %v554_v57 = vmul.f32 %v2144_v16, %v553_v51  ;;  %v912_v16 = vld [vmem:[#allocation9] sm:$0xff]  ;;  %p1678_p3 = scmp.lt.s32.totalorder %s1676_s15, %s1670_s25 }
  0xdc   : > { %v542_v56 = vadd.f32 %v540_v49, %v535_v47  ;;  %v541_v58 = vmul.f32 %v2128_v12, %v539_v48  ;;  %v548_v9 = vmul.f32 %v2137_v14, %v546_v50  ;;  %v555_v61 = vmul.f32 %v2147_v17, %v553_v51  ;;  %p2497_p10 = scmp.ne.s32.totalorder %s2495_s21, 0 }
  0xdd   : > { %1322 = vmatprep.mubr.msk.f32.mxu1 %vm563_vm0, %v530_v53  ;;  %v531_v59 = vadd.f32 %v529_v43, %v524_v54  ;;  %p1679_p5 = por %p1678_p3, %p1677_p13 }
  0xde   : > { %v549_v60 = vadd.f32 %v547_v55, %v542_v56  ;;  %v543_v11 = vadd.f32 %v541_v58, %v536_v52  ;;  %p1672_p11 = pnand %p1671_p7, %p2497_p10 }
  0xdf   : > { %1323 = vmatmul.mubr.msk.f32.gmra.mrb[4].mxu1 %vm563_vm0, %v531_v59 }
  0xe0   : > { %v556_v10 = vadd.f32 %v554_v57, %v549_v60  ;;  %v550_v62 = vadd.f32 %v548_v9, %v543_v11  ;;  %1363 = vmatprep.mubr.msk.f32.mxu1 %vm916_vm1, %v912_v16  ;;  %p1673_p0 = pneg %p1672_p11 }
  0xe2   : > { %1348 = vmatprep.mubr.msk.f32.mxu0 %vm563_vm0, %v556_v10  ;;  %v557_v13 = vadd.f32 %v555_v61, %v550_v62  ;;  %p1680_p8 = pnand %p1679_p5, %p1673_p0 }
  0xe4   : > { %1349 = vmatmul.mubr.msk.f32.gmra.mrb[4].mxu0 %vm563_vm0, %v557_v13 }
 0x19f   : > { %v1318_v12 = vpop.f32.mrb[0].mxu1 }
 0x1a0   : > { %v648_v14 = vpop.f32.mrb[1].mxu1 }
 0x1a4   : > { %v1344_v63 = vpop.f32.mrb[0].mxu0 }
 0x1a5   : > { %v1393_v0 = vadd.f32 %v1344_v63, %v1318_v12  ;;  %v877_v1 = vpop.f32.mrb[1].mxu0 }
 0x1a6   : > { %v1394_v2 = vadd.f32 %v877_v1, %v648_v14 }
 0x1a8   : > { %v1381_v17 = vpack.c.bf16 %v1393_v0, %v1394_v2 }
 0x1a9   : > { %v1321_v3 = vpop.f32.mrb[2].mxu1 }
 0x1aa   : > { %v658_v4 = vpop.f32.mrb[3].mxu1  ;;  %1382 = vmatprep.subr.bf16.mxu1 %v1381_v17 }
 0x1ab   : > { %1384 = vmatpush3.bf16.msra.mxu1 %v1381_v17 }
 0x1ad   : > { %v1347_v5 = vpop.f32.mrb[2].mxu0 }
 0x1ae   : > { %v1395_v6 = vadd.f32 %v1347_v5, %v1321_v3  ;;  %v887_v7 = vpop.f32.mrb[3].mxu0 }
 0x1af   : > { %v1396_v8 = vadd.f32 %v887_v7, %v658_v4 }
 0x1b1   : > { %v1385_v15 = vpack.c.bf16 %v1395_v6, %v1396_v8 }
 0x1b2   : > { %v1324_v18 = vpop.f32.mrb[4].mxu1 }
 0x1b3   : > { %v668_v19 = vpop.f32.mrb[5].mxu1  ;;  %1386 = vmatprep.subr.bf16.mxu1 %v1385_v15 }
 0x1b4   : > { %1388 = vmatpush3.bf16.msra.mxu1 %v1385_v15 }
 0x1b7   : > { %v1350_v20 = vpop.f32.mrb[4].mxu0 }
 0x1b8   : > { %v1397_v21 = vadd.f32 %v1350_v20, %v1324_v18  ;;  %v897_v22 = vpop.f32.mrb[5].mxu0 }
 0x1b9   : > { %v1398_v23 = vadd.f32 %v897_v22, %v668_v19 }
 0x1bb   : > { %v1389_v24 = vpack.c.bf16 %v1397_v21, %v1398_v23 }
 0x1bd   : > { %1390 = vmatprep.subr.bf16.mxu1 %v1389_v24 }
 0x1be   : > { %1392 = vmatpush3.bf16.msra.mxu1 %v1389_v24 }
 0x1c1   : > { %1364 = vmatmul.mubr.msk.f32.vlgmr.msra.gmra.mrb[6].mxu1 %vm916_vm1, %v913_v25 }
 0x1c2   : > { %1366 = vmatprep.mubr.msk.f32.mxu1 %vm916_vm1, %v914_v26 }
 0x1c5   : > { %1367 = vmatmul.mubr.msk.f32.gmra.mrb[8].mxu1 %vm916_vm1, %v915_v27 }
 0x294   : > { %v1365_v28 = vpop.f32.mrb[6].mxu1 }
 0x295   : > { %v995_v29 = vpop.f32.mrb[7].mxu1  ;;  %v1018_v33 = vsel %vm1014_vm2, %v1365_v28, 0.0 }
 0x296   : > { %v1015_v30 = vsel %vm1014_vm2, %v995_v29, 0.0 }
 0x297   : > { %1016 = vadd.xlane.f32.xlu0 %v1015_v30 }
 0x298   : > { %v1368_v31 = vpop.f32.mrb[8].mxu1 }
 0x299   : > { %v1005_v32 = vpop.f32.mrb[9].mxu1  ;;  %v1024_v35 = vsel %vm1014_vm2, %v1368_v31, 0.0 }
 0x29a   : > { %v1021_v34 = vsel %vm1014_vm2, %v1005_v32, 0.0 }
 0x29b   : > { %1019 = vadd.xlane.f32.xlu0 %v1018_v33  ;;  %1022 = vadd.xlane.f32.xlu1 %v1021_v34 }
 0x29f   : > { %1025 = vadd.xlane.f32.xlu1 %v1024_v35 }
 0x324   : > { %v1017_v36 = vpop.xlane.xlu0 %1016 }
 0x328   : > { %v1020_v37 = vpop.xlane.xlu0 %1019  ;;  %v1023_v38 = vpop.xlane.xlu1 %1022 }
 0x329   : > { %v1027_v39 = vadd.f32 %v1020_v37, %v1017_v36 }
 0x32b   : > { %v1028_v40 = vadd.f32 %v1027_v39, %v1023_v38 }
 0x32c   : > { %v1026_v41 = vpop.xlane.xlu1 %1025 }
 0x32d   : > { %v1029_v42 = vadd.f32 %v1028_v40, %v1026_v41 }
 0x32f   : > { %v1030_v43 = vrot.slane %v1029_v42, 4 }
 0x331   : > { %v1031_v44 = vadd.f32 %v1030_v43, %v1029_v42 }
 0x333   : > { %v1032_v45 = vrot.slane %v1031_v44, 2 }
 0x335   : > { %v1033_v46 = vadd.f32 %v1032_v45, %v1031_v44 }
 0x337   : > { %v1034_v47 = vrot.slane %v1033_v46, 1 }
 0x339   : > { %v1035_v48 = vadd.f32 %v1034_v47, %v1033_v46 }
 0x33b   : > { %v1036_v49 = vmul.f32 0.0009765625, %v1035_v48 }
 0x33d   : > { %v1038_v50 = vsub.f32 %v1365_v28, %v1036_v49  ;;  %v1037_v51 = vsub.f32 %v995_v29, %v1036_v49  ;;  %v1040_v52 = vsub.f32 %v1368_v31, %v1036_v49  ;;  %v1039_v53 = vsub.f32 %v1005_v32, %v1036_v49 }
 0x33f   : > { %v1042_v54 = vmul.f32 %v1038_v50, %v1038_v50  ;;  %v1041_v55 = vmul.f32 %v1037_v51, %v1037_v51  ;;  %v1044_v58 = vmul.f32 %v1040_v52, %v1040_v52  ;;  %v1043_v9 = vmul.f32 %v1039_v53, %v1039_v53 }
 0x341   : > { %v1048_v56 = vsel %vm1014_vm2, %v1042_v54, 0.0  ;;  %v1045_v57 = vsel %vm1014_vm2, %v1041_v55, 0.0  ;;  %v1054_v59 = vsel %vm1014_vm2, %v1044_v58, 0.0  ;;  %v1051_v60 = vsel %vm1014_vm2, %v1043_v9, 0.0 }
 0x342   : > { %1049 = vadd.xlane.f32.xlu1 %v1048_v56  ;;  %1046 = vadd.xlane.f32.xlu0 %v1045_v57 }
 0x346   : > { %1055 = vadd.xlane.f32.xlu1 %v1054_v59  ;;  %1052 = vadd.xlane.f32.xlu0 %v1051_v60 }
 0x3cf   : > { %v1050_v11 = vpop.xlane.xlu1 %1049  ;;  %v1047_v61 = vpop.xlane.xlu0 %1046 }
 0x3d0   : > { %v1057_v10 = vadd.f32 %v1050_v11, %v1047_v61 }
 0x3d3   : > { %v1053_v62 = vpop.xlane.xlu0 %1052  ;;  %v1056_v16 = vpop.xlane.xlu1 %1055 }
 0x3d4   : > { %v1058_v13 = vadd.f32 %v1057_v10, %v1053_v62 }
 0x3d6   : > { %v1059_v12 = vadd.f32 %v1058_v13, %v1056_v16 }
 0x3d8   : > { %v1060_v14 = vrot.slane %v1059_v12, 4 }
 0x3da   : > { %v1061_v63 = vadd.f32 %v1060_v14, %v1059_v12 }
 0x3dc   : > { %v1062_v0 = vrot.slane %v1061_v63, 2 }
 0x3de   : > { %v1063_v1 = vadd.f32 %v1062_v0, %v1061_v63 }
 0x3e0   : > { %v1064_v2 = vrot.slane %v1063_v1, 1 }
 0x3e2   : > { %v1065_v17 = vadd.f32 %v1064_v2, %v1063_v1 }
 0x3e4   : > { %v1066_v3 = vmul.f32 0.0009765625, %v1065_v17 }
 0x3e6   : > { %v1067_v4 = vadd.f32 1e-05, %v1066_v3 }
 0x3e8   : > { %1552 = vrsqrt.f32 %v1067_v4 }
 0x3f2   : > { %v1553_v5 = vpop.eup %1552 }
 0x3f3   : > { %v1069_v6 = vmul.f32 %v1553_v5, %v1037_v51  ;;  %v1070_v7 = vmul.f32 %v1553_v5, %v1038_v50  ;;  %v1071_v8 = vmul.f32 %v1553_v5, %v1039_v53  ;;  %v1072_v15 = vmul.f32 %v1553_v5, %v1040_v52 }
 0x3f5   : > { %v1073_v18 = vmax.f32 %v1069_v6, 0.0  ;;  %v1074_v19 = vmax.f32 %v1070_v7, 0.0  ;;  %v1075_v20 = vmax.f32 %v1071_v8, 0.0  ;;  %v1076_v21 = vmax.f32 %v1072_v15, 0.0 }
 0x3f7   : > { %1077 = vst.msk [vmem:[%s312_s18] sm:$0xff] %vm1014_vm2, %v1073_v18  ;;  %1078 = vst.msk [vmem:[%s312_s18 + $0x8] sm:$0xff] %vm1014_vm2, %v1074_v19 }
 0x3f8   : > { %1079 = vst.msk [vmem:[%s312_s18 + $0x10] sm:$0xff] %vm1014_vm2, %v1075_v20  ;;  %1080 = vst.msk [vmem:[%s312_s18 + $0x18] sm:$0xff] %vm1014_vm2, %v1076_v21 }
 0x3f9   : > { %1683 = shalt.err (!%p1680_p8)
}
 0x3fa   : > { %s1684_s3 = scalar_lea.hbm %s2379_s4, 512  ;;  %s1688_s6 = scalar_lea.hbm %s2496_s12, 2048 }
 0x3fb   : > { %p1685_p12 = scmp.ne.s32.totalorder %s2379_s4, %s1684_s3  ;;  %p1689_p9 = scmp.lt.u32.totalorder %s2379_s4, %s2496_s12 }
 0x3fc   : > { %p1690_p1 = scmp.lt.u32.totalorder %s1688_s6, %s1684_s3  ;;  %p1692_p7 = scmp.lt.u32.totalorder %s1684_s3, %s2379_s4 }
 0x3fd   : > { %p1686_p4 = pnand %p1685_p12, %p2497_p10 }
 0x3fe   : > { %p1691_p6 = por %p1690_p1, %p1689_p9 }
 0x3ff   : > { %p1687_p2 = pneg %p1686_p4 }
 0x400   : > { %p1693_p11 = por %p1692_p7, %p1691_p6 }
 0x402   : > { %p1694_p0 = pnand %p1693_p11, %p1687_p2 }
 0x404   : > { %1697 = shalt.err (!%p1694_p0)
}
 0x405   : > { %s1814_s1 = smov 128   ;;  %s1815_s14 = smov 8  }
 0x406   : > { %1423 = dma.vmem_to_hbm [thread:$0]  (%p2497_p10), %s2381_s30, 512, %s2379_s4, %s2387_s24, %s1814_s1, %s1814_s1, %s1815_s14  }
 0x407 PF: > { %s2498_s18 = sld [smem:[#allocation18_spill]]  ;;  %s2499_s2 = sld [smem:[#allocation20_spill]] }
 0x408   : > { %p1455_p13 = scmp.ge.s32.totalorder %s1804_s28, 2 }
 0x40d   : > { %s1112_s5 = sand.u32 1, %s2498_s18   ;;  %p2500_p3 = scmp.ne.s32.totalorder %s2499_s2, 0 }
 0x40e   : > { %s1113_s25 = scalar_lea.sflag [#allocation4], %s1112_s5 }
 0x40f   : > { %p1443_p5 = pnand %p1455_p13, %p2500_p3 }
 0x411   : > { %1759 = dma.done.wait (!%p1443_p5), %s1113_s25, 512  }
 0x412   : > { %1761 = vsyncadd (!%p1443_p5), %s1113_s25, 4294966784  ;;  %s24_s28 = sadd.s32 1, %s1804_s28   ;;  %s2501_s30 = sld [smem:[#allocation21_spill]] }
 0x413   : > { %p21_p8 = scmp.ge.s32.totalorder %s24_s28, 6   ;;  %s2502_s18 = smov %s1768_s19 }
 0x414   : > { %s2503_s19 = smov %s1772_s20  ;;  %s2504_s20 = smov %s2027_s17 }
 0x415   : > { %s2505_s21 = smov %s1780_s22  ;;  %s2506_s22 = smov %s1784_s23 }
 0x416   : > { %s2507_s23 = smov %s2024_s8  ;;  %s2508_s24 = smov %s1796_s26 }
 0x417   : > { %s2509_s25 = smov %s1800_s27  ;;  %s2511_s27 = smov %s2517_s29 }
 0x418   : > { %s2510_s26 = smov %s2501_s30  ;;  %23 = sbr.rel (!%p21_p8) target bundleno = 18 (0x12), region = 107 }
 0x41f   :  { %1118 = vsyncpa [#allocation3], 1 }
 0x420   :  { %1120 = vsyncpa [#allocation3 + $0x1], 1 }
 0x421   :  { %1121 = vsyncpa [#allocation10], 1 }
 0x422   :  { %1122 = vsyncpa [#allocation4], 1 }
 0x423   :  { %1124 = vsyncpa [#allocation4 + $0x1], 1 }
 0x424   :  { %1125 = vsyncpa [#allocation5], 1 }
 0x425   :  { %1127 = vsyncpa [#allocation5 + $0x1], 1 }
 0x426   :  { %1128 = vsyncpa [#allocation8], 1 }

</bundles_post_ra>
